<compile_context>
chip_gen: v7x
topology: tpu7x:2x2x1
jax: 0.10.0
libtpu: 0.0.40
codegen_flags: <defaults>
</compile_context>

<pallas_src>
import jax
import jax.numpy as jnp
from jax.experimental import pallas as pl
from jax.experimental.pallas import tpu as pltpu


def mlp_kernel(x_ref, w1_ref, b1_ref, w2_ref, b2_ref, o_ref):
    x = x_ref[...]          # (5, TB)  f32, batch on the lane axis
    w1 = w1_ref[...]        # (4, 5)
    w2 = w2_ref[...]        # (2, 4)

    # Layer 1: unrolled VPU FMAs (outer-product accumulate), K=5 terms,
    # bias folded into the first term; (4,1) bias lane-broadcasts.
    h = w1[:, 0:1] * x[0:1, :] + b1_ref[...]        # (4, TB)
    for k in range(1, 5):
        h = h + w1[:, k:k + 1] * x[k:k + 1, :]
    h = jnp.maximum(h, 0.0)                         # ReLU

    # Layer 2: unrolled VPU FMAs, K=4 terms, bias folded into the first term.
    o = w2[:, 0:1] * h[0:1, :] + b2_ref[...]        # (2, TB)
    for k in range(1, 4):
        o = o + w2[:, k:k + 1] * h[k:k + 1, :]

    o_ref[...] = o.astype(o_ref.dtype)


def _round_up(n, m):
    return ((n + m - 1) // m) * m


def mlp_forward_features_minor(xT, w1, b1, w2, b2, *, block_b=65536,
                               out_dtype=jnp.float32):
    """Kernel-native entry point.

    xT: (5, B) f32 (features-minor, batch on the lane axis); returns (2, B).
    w1: (4, 5); b1: (4,); w2: (2, 4); b2: (2,)  -- PyTorch (out, in) layout.
    block_b: batch-lane tile; keep <= 65536 unless vmem_limit_bytes is raised.
    out_dtype: set to jnp.bfloat16 if the consumer tolerates it (saves ~14% of
               kernel HBM bytes; the kernel is purely HBM-bandwidth bound).
    """
    B = xT.shape[1]

    # Pad only to a multiple of 128 lanes (cheap); no pad to a multiple of tb.
    Bp = _round_up(B, 128)
    if Bp != B:
        xT = jnp.pad(xT, ((0, 0), (0, Bp - B)))

    # Tile sizing:
    #   * multiple of 128 lanes,
    #   * as large as possible (amortize ~0.35 us per-step overhead),
    #   * capped so double-buffered tiles (~128*tb bytes) fit default scoped
    #     VMEM on v5e/v6e/v7x,
    #   * aim for >= 4 grid steps when the batch is big enough (v7x megacore
    #     sharding + DMA/compute overlap within each TensorCore).
    tb = min(block_b, Bp, max(128, _round_up(pl.cdiv(Bp, 4), 128)))
    grid = (pl.cdiv(Bp, tb),)   # boundary block (if any) is masked by Pallas

    b1c = b1.reshape(4, 1).astype(jnp.float32)
    b2c = b2.reshape(2, 1).astype(jnp.float32)

    flops = 2 * Bp * (5 * 4 + 4 * 2) + Bp * (4 + 2 + 4)     # matmuls + bias + relu
    bytes_accessed = 4 * (Bp * 5 + 4 * 5 + 4 + 2 * 4 + 2) + \
        jnp.dtype(out_dtype).itemsize * Bp * 2

    oT = pl.pallas_call(
        mlp_kernel,
        out_shape=jax.ShapeDtypeStruct((2, Bp), out_dtype),
        grid_spec=pltpu.PrefetchScalarGridSpec(
            num_scalar_prefetch=0,
            grid=grid,
            in_specs=[
                pl.BlockSpec((5, tb), lambda i: (0, i)),   # x tile (batch on lanes)
                pl.BlockSpec((4, 5), lambda i: (0, 0)),    # W1, VMEM-resident
                pl.BlockSpec((4, 1), lambda i: (0, 0)),    # b1
                pl.BlockSpec((2, 4), lambda i: (0, 0)),    # W2
                pl.BlockSpec((2, 1), lambda i: (0, 0)),    # b2
            ],
            out_specs=pl.BlockSpec((2, tb), lambda i: (0, i)),
        ),
        compiler_params=pltpu.CompilerParams(
            dimension_semantics=("parallel",),             # megacore-shardable batch axis
        ),
        cost_estimate=pl.CostEstimate(
            flops=flops, transcendentals=0, bytes_accessed=bytes_accessed),
    )(xT, w1.astype(jnp.float32), b1c, w2.astype(jnp.float32), b2c)

    return oT if Bp == B else oT[:, :B]                    # (2, B)


def mlp_forward(x, w1, b1, w2, b2, **kwargs):
    """PyTorch-layout convenience wrapper: x (B, 5) -> (B, 2).

    The two transposes here are XLA relayouts that roughly double end-to-end
    HBM traffic for this memory-bound op; producers/consumers that can use the
    (5, B)/(2, B) features-minor layout should call
    `mlp_forward_features_minor` directly.
    """
    oT = mlp_forward_features_minor(jnp.transpose(x), w1, b1, w2, b2, **kwargs)
    return jnp.transpose(oT)                               # (B, 2)


def init_params(key):
    # Deterministic init mimicking nn.Linear's uniform(-1/sqrt(fan_in), +...).
    # Shapes follow PyTorch's (out_features, in_features) convention.
    k1, k2, k3, k4 = jax.random.split(key, 4)
    bound1 = 1.0 / jnp.sqrt(5.0)
    bound2 = 1.0 / jnp.sqrt(4.0)
    w1 = jax.random.uniform(k1, (4, 5), jnp.float32, -bound1, bound1)
    b1 = jax.random.uniform(k2, (4,), jnp.float32, -bound1, bound1)
    w2 = jax.random.uniform(k3, (2, 4), jnp.float32, -bound2, bound2)
    b2 = jax.random.uniform(k4, (2,), jnp.float32, -bound2, bound2)
    return w1, b1, w2, b2


if __name__ == "__main__":
    key = jax.random.PRNGKey(0)
    kx, kp = jax.random.split(key)
    batch = 8
    x = jax.random.normal(kx, (batch, 5), jnp.float32)
    w1, b1, w2, b2 = init_params(kp)

    out = mlp_forward(x, w1, b1, w2, b2)
    out = jax.block_until_ready(out)

    # Pure-JAX reference (PyTorch semantics: x @ W^T + b).
    ref = jnp.maximum(x @ w1.T + b1, 0.0) @ w2.T + b2
    assert out.shape == (batch, 2)
    assert jnp.allclose(out, ref, atol=1e-5, rtol=1e-5)

    # Also exercise the kernel-native features-minor entry point.
    outT = jax.block_until_ready(
        mlp_forward_features_minor(jnp.transpose(x), w1, b1, w2, b2))
    assert outT.shape == (2, batch)
    assert jnp.allclose(jnp.transpose(outT), ref, atol=1e-5, rtol=1e-5)

    print("KERNEL_OK")
</pallas_src>

<mosaic_0001>
module attributes {stable_mosaic.version = 11 : i64} {
  func.func @mlp_kernel(%arg0: i32, %arg1: memref<5x128xf32, #tpu.memory_space<vmem>>, %arg2: memref<4x5xf32, #tpu.memory_space<vmem>>, %arg3: memref<4x1xf32, #tpu.memory_space<vmem>>, %arg4: memref<2x4xf32, #tpu.memory_space<vmem>>, %arg5: memref<2x1xf32, #tpu.memory_space<vmem>>, %arg6: memref<2x128xf32, #tpu.memory_space<vmem>>) attributes {dimension_semantics = [#tpu.dimension_semantics<parallel>], iteration_bounds = array<i64: 1>, scalar_prefetch = 0 : i64, scratch_operands = 0 : i64, tpu.core_type = #tpu.core_type<tc>, window_params = [{transform_indices = @transform_0, window_bounds = array<i64: 5, 128>}, {pipeline_mode = #tpu.pipeline_mode<synchronous>, transform_indices = @transform_1, window_bounds = array<i64: 4, 5>}, {pipeline_mode = #tpu.pipeline_mode<synchronous>, transform_indices = @transform_2, window_bounds = array<i64: 4, 1>}, {pipeline_mode = #tpu.pipeline_mode<synchronous>, transform_indices = @transform_3, window_bounds = array<i64: 2, 4>}, {pipeline_mode = #tpu.pipeline_mode<synchronous>, transform_indices = @transform_4, window_bounds = array<i64: 2, 1>}, {transform_indices = @transform_5, window_bounds = array<i64: 2, 128>}]} {
    %c0 = arith.constant 0 : index
    %c0_0 = arith.constant 0 : index
    %0 = vector.load %arg1[%c0, %c0_0] : memref<5x128xf32, #tpu.memory_space<vmem>>, vector<5x128xf32>
    %c0_1 = arith.constant 0 : index
    %c0_2 = arith.constant 0 : index
    %1 = vector.load %arg2[%c0_1, %c0_2] : memref<4x5xf32, #tpu.memory_space<vmem>>, vector<4x5xf32>
    %c0_3 = arith.constant 0 : index
    %c0_4 = arith.constant 0 : index
    %2 = vector.load %arg4[%c0_3, %c0_4] : memref<2x4xf32, #tpu.memory_space<vmem>>, vector<2x4xf32>
    %3 = vector.extract_strided_slice %1 {offsets = [0, 0], sizes = [4, 1], strides = [1, 1]} : vector<4x5xf32> to vector<4x1xf32>
    %4 = vector.extract_strided_slice %0 {offsets = [0, 0], sizes = [1, 128], strides = [1, 1]} : vector<5x128xf32> to vector<1x128xf32>
    %5 = vector.broadcast %3 : vector<4x1xf32> to vector<4x128xf32>
    %6 = vector.broadcast %4 : vector<1x128xf32> to vector<4x128xf32>
    %7 = arith.mulf %5, %6 : vector<4x128xf32>
    %c0_5 = arith.constant 0 : index
    %c0_6 = arith.constant 0 : index
    %8 = vector.load %arg3[%c0_5, %c0_6] : memref<4x1xf32, #tpu.memory_space<vmem>>, vector<4x1xf32>
    %9 = vector.broadcast %8 : vector<4x1xf32> to vector<4x128xf32>
    %10 = arith.addf %7, %9 : vector<4x128xf32>
    %11 = vector.extract_strided_slice %1 {offsets = [0, 1], sizes = [4, 1], strides = [1, 1]} : vector<4x5xf32> to vector<4x1xf32>
    %12 = vector.extract_strided_slice %0 {offsets = [1, 0], sizes = [1, 128], strides = [1, 1]} : vector<5x128xf32> to vector<1x128xf32>
    %13 = vector.broadcast %11 : vector<4x1xf32> to vector<4x128xf32>
    %14 = vector.broadcast %12 : vector<1x128xf32> to vector<4x128xf32>
    %15 = arith.mulf %13, %14 : vector<4x128xf32>
    %16 = arith.addf %10, %15 : vector<4x128xf32>
    %17 = vector.extract_strided_slice %1 {offsets = [0, 2], sizes = [4, 1], strides = [1, 1]} : vector<4x5xf32> to vector<4x1xf32>
    %18 = vector.extract_strided_slice %0 {offsets = [2, 0], sizes = [1, 128], strides = [1, 1]} : vector<5x128xf32> to vector<1x128xf32>
    %19 = vector.broadcast %17 : vector<4x1xf32> to vector<4x128xf32>
    %20 = vector.broadcast %18 : vector<1x128xf32> to vector<4x128xf32>
    %21 = arith.mulf %19, %20 : vector<4x128xf32>
    %22 = arith.addf %16, %21 : vector<4x128xf32>
    %23 = vector.extract_strided_slice %1 {offsets = [0, 3], sizes = [4, 1], strides = [1, 1]} : vector<4x5xf32> to vector<4x1xf32>
    %24 = vector.extract_strided_slice %0 {offsets = [3, 0], sizes = [1, 128], strides = [1, 1]} : vector<5x128xf32> to vector<1x128xf32>
    %25 = vector.broadcast %23 : vector<4x1xf32> to vector<4x128xf32>
    %26 = vector.broadcast %24 : vector<1x128xf32> to vector<4x128xf32>
    %27 = arith.mulf %25, %26 : vector<4x128xf32>
    %28 = arith.addf %22, %27 : vector<4x128xf32>
    %29 = vector.extract_strided_slice %1 {offsets = [0, 4], sizes = [4, 1], strides = [1, 1]} : vector<4x5xf32> to vector<4x1xf32>
    %30 = vector.extract_strided_slice %0 {offsets = [4, 0], sizes = [1, 128], strides = [1, 1]} : vector<5x128xf32> to vector<1x128xf32>
    %31 = vector.broadcast %29 : vector<4x1xf32> to vector<4x128xf32>
    %32 = vector.broadcast %30 : vector<1x128xf32> to vector<4x128xf32>
    %33 = arith.mulf %31, %32 : vector<4x128xf32>
    %34 = arith.addf %28, %33 : vector<4x128xf32>
    %cst = arith.constant 0.000000e+00 : f32
    %35 = vector.broadcast %cst : f32 to vector<4x128xf32>
    %36 = arith.maximumf %34, %35 : vector<4x128xf32>
    %37 = vector.extract_strided_slice %2 {offsets = [0, 0], sizes = [2, 1], strides = [1, 1]} : vector<2x4xf32> to vector<2x1xf32>
    %38 = vector.extract_strided_slice %36 {offsets = [0, 0], sizes = [1, 128], strides = [1, 1]} : vector<4x128xf32> to vector<1x128xf32>
    %39 = vector.broadcast %37 : vector<2x1xf32> to vector<2x128xf32>
    %40 = vector.broadcast %38 : vector<1x128xf32> to vector<2x128xf32>
    %41 = arith.mulf %39, %40 : vector<2x128xf32>
    %c0_7 = arith.constant 0 : index
    %c0_8 = arith.constant 0 : index
    %42 = vector.load %arg5[%c0_7, %c0_8] : memref<2x1xf32, #tpu.memory_space<vmem>>, vector<2x1xf32>
    %43 = vector.broadcast %42 : vector<2x1xf32> to vector<2x128xf32>
    %44 = arith.addf %41, %43 : vector<2x128xf32>
    %45 = vector.extract_strided_slice %2 {offsets = [0, 1], sizes = [2, 1], strides = [1, 1]} : vector<2x4xf32> to vector<2x1xf32>
    %46 = vector.extract_strided_slice %36 {offsets = [1, 0], sizes = [1, 128], strides = [1, 1]} : vector<4x128xf32> to vector<1x128xf32>
    %47 = vector.broadcast %45 : vector<2x1xf32> to vector<2x128xf32>
    %48 = vector.broadcast %46 : vector<1x128xf32> to vector<2x128xf32>
    %49 = arith.mulf %47, %48 : vector<2x128xf32>
    %50 = arith.addf %44, %49 : vector<2x128xf32>
    %51 = vector.extract_strided_slice %2 {offsets = [0, 2], sizes = [2, 1], strides = [1, 1]} : vector<2x4xf32> to vector<2x1xf32>
    %52 = vector.extract_strided_slice %36 {offsets = [2, 0], sizes = [1, 128], strides = [1, 1]} : vector<4x128xf32> to vector<1x128xf32>
    %53 = vector.broadcast %51 : vector<2x1xf32> to vector<2x128xf32>
    %54 = vector.broadcast %52 : vector<1x128xf32> to vector<2x128xf32>
    %55 = arith.mulf %53, %54 : vector<2x128xf32>
    %56 = arith.addf %50, %55 : vector<2x128xf32>
    %57 = vector.extract_strided_slice %2 {offsets = [0, 3], sizes = [2, 1], strides = [1, 1]} : vector<2x4xf32> to vector<2x1xf32>
    %58 = vector.extract_strided_slice %36 {offsets = [3, 0], sizes = [1, 128], strides = [1, 1]} : vector<4x128xf32> to vector<1x128xf32>
    %59 = vector.broadcast %57 : vector<2x1xf32> to vector<2x128xf32>
    %60 = vector.broadcast %58 : vector<1x128xf32> to vector<2x128xf32>
    %61 = arith.mulf %59, %60 : vector<2x128xf32>
    %62 = arith.addf %56, %61 : vector<2x128xf32>
    %c0_9 = arith.constant 0 : index
    %c0_10 = arith.constant 0 : index
    %63 = vector.load %arg6[%c0_9, %c0_10] : memref<2x128xf32, #tpu.memory_space<vmem>>, vector<2x128xf32>
    tpu.vector_store %arg6[%c0_9, %c0_10], %62 {strides = array<i32>} : memref<2x128xf32, #tpu.memory_space<vmem>>, vector<2x128xf32>,
    return
  }
  func.func @transform_0(%arg0: i32) -> (i32, i32) {
    %c0_i32 = arith.constant 0 : i32
    %c0_i32_0 = arith.constant 0 : i32
    return %c0_i32, %arg0 : i32, i32
  }
  func.func @transform_1(%arg0: i32) -> (i32, i32) {
    %c0_i32 = arith.constant 0 : i32
    %c0_i32_0 = arith.constant 0 : i32
    %c0_i32_1 = arith.constant 0 : i32
    return %c0_i32, %c0_i32_0 : i32, i32
  }
  func.func @transform_2(%arg0: i32) -> (i32, i32) {
    %c0_i32 = arith.constant 0 : i32
    %c0_i32_0 = arith.constant 0 : i32
    %c0_i32_1 = arith.constant 0 : i32
    return %c0_i32, %c0_i32_0 : i32, i32
  }
  func.func @transform_3(%arg0: i32) -> (i32, i32) {
    %c0_i32 = arith.constant 0 : i32
    %c0_i32_0 = arith.constant 0 : i32
    %c0_i32_1 = arith.constant 0 : i32
    return %c0_i32, %c0_i32_0 : i32, i32
  }
  func.func @transform_4(%arg0: i32) -> (i32, i32) {
    %c0_i32 = arith.constant 0 : i32
    %c0_i32_0 = arith.constant 0 : i32
    %c0_i32_1 = arith.constant 0 : i32
    return %c0_i32, %c0_i32_0 : i32, i32
  }
  func.func @transform_5(%arg0: i32) -> (i32, i32) {
    %c0_i32 = arith.constant 0 : i32
    %c0_i32_0 = arith.constant 0 : i32
    return %c0_i32, %arg0 : i32, i32
  }
}

</mosaic_0001>

<bundles_post_ra>
// kernel: tpu_custom_call.1
= control target key start
LH: loop header
LB: loop body
LE: loop exit
PB: predicated region body
PF: predicated region fallthrough
CT: control target
= control target key end

     0   :  { %v184_v1 = vmov 1   ;;  %v185_v2 = vmov 0   ;;  %s247_s0 = inlined_call_operand.vmem [shape: f32[5,128], index: 0, kind: input, shape index: {}]   ;;  %s248_s1 = inlined_call_operand.vmem [shape: f32[4,5], index: 1, kind: input, shape index: {}]   ;;  %s249_s2 = inlined_call_operand.vmem [shape: f32[4,1], index: 2, kind: input, shape index: {}]   ;;  %s250_s3 = inlined_call_operand.vmem [shape: f32[2,4], index: 3, kind: input, shape index: {}]   ;;  %s251_s4 = inlined_call_operand.vmem [shape: f32[2,1], index: 4, kind: input, shape index: {}]   ;;  %s252_s5 = inlined_call_operand.hbm [shape: f32[2,128], index: 5, kind: output, shape index: {}]  }
   0x1   :  { %v22_v0 = vld [vmem:[%s248_s1] sm:$0xf]  ;;  %151 = vset.pattern.permute.xlu1 %v184_v1  ;;  %150 = vset.pattern.permute.xlu0 %v185_v2 }
   0x2   :  { %42 = vperm.xlu1 %151, %v22_v0   ;;  %26 = vperm.xlu0 %150, %v22_v0  }
   0x3   :  { %10 = vsyncpa [#allocation3], 0  ;;  %v34_v3 = vld [vmem:[%s249_s2] sm:$0xf]  ;;  %v186_v4 = vmov 2   ;;  %v187_v5 = vmov 3   ;;  %v29_v9 = vlaneseq }
   0x4   :  { %v188_v6 = vmov 4   ;;  %v92_v7 = vld [vmem:[%s251_s4] sm:$0x3] }
   0x5   :  { %v23_v8 = vld [vmem:[%s250_s3] sm:$0x3]  ;;  %v30_v10 = vshrl.u32 %v29_v9, 7 }
   0x6   :  { %152 = vset.pattern.permute.xlu1 %v186_v4  ;;  %37 = vperm.xlu0 %150, %v34_v3   ;;  %v21_v12 = vld [vmem:[%s247_s0] sm:$0x1f]  ;;  %s189_s0 = smov [#allocation2]  }
   0x7   :  { %52 = vperm.xlu1 %152, %v22_v0   ;;  %v31_v11 = vsub.s32 0, %v30_v10  ;;  %v47_v13 = vsub.s32 1, %v30_v10  ;;  %v57_v15 = vsub.s32 2, %v30_v10  ;;  %v67_v21 = vsub.s32 3, %v30_v10  ;;  %s136_s3 = sshll.u32 %s189_s0, 4  ;;  %s137_s3 = int_to_ptr.vmem [resolvable:$true] %s136_s3 }
   0x8   :  { %v77_v22 = vsub.s32 4, %v30_v10  ;;  %s160_s4 = scalar_lea.vmem %s137_s3, 32  ;;  %p165_p1 = scmp.lt.s32.totalorder %s137_s3, %s137_s3 }
   0x9   :  { %v32_v14 = vrot.slane %v21_v12, %v31_v11  ;;  %v48_v18 = vrot.slane %v21_v12, %v47_v13  ;;  %v58_v20 = vrot.slane %v21_v12, %v57_v15  ;;  %v68_v28 = vrot.slane %v21_v12, %v67_v21  ;;  %p161_p0 = scmp.ne.s32.totalorder %s137_s3, %s160_s4  ;;  %p166_p2 = scmp.lt.s32.totalorder %s160_s4, %s160_s4 }
   0xa   :  { %153 = vset.pattern.permute.xlu0 %v187_v5  ;;  %v78_v30 = vrot.slane %v21_v12, %v77_v22 }
   0xb   :  { %154 = vset.pattern.permute.xlu1 %v188_v6  ;;  %62 = vperm.xlu0 %153, %v22_v0   ;;  %p167_p3 = por %p166_p2, %p165_p1 }
   0xc   :  { %72 = vperm.xlu1 %154, %v22_v0  }
   0xd   :  { %p168_p4 = pnand %p167_p3, %p161_p0 }
   0xf   :  { %156 = vset.pattern.permute.xlu0 %v185_v2 }
  0x10   :  { %155 = vset.pattern.permute.xlu1 %v185_v2  ;;  %95 = vperm.xlu0 %156, %v92_v7  }
  0x11   :  { %84 = vperm.xlu1 %155, %v23_v8  }
  0x14   :  { %159 = vset.pattern.permute.xlu0 %v187_v5 }
  0x15   :  { %157 = vset.pattern.permute.xlu1 %v184_v1  ;;  %120 = vperm.xlu0 %159, %v23_v8  }
  0x16   :  { %100 = vperm.xlu1 %157, %v23_v8  }
  0x1a   :  { %158 = vset.pattern.permute.xlu1 %v186_v4 }
  0x1b   :  { %110 = vperm.xlu1 %158, %v23_v8  }
  0x81   :  { %v43_v16 = vpop.permute.xlu1 %42  ;;  %v27_v17 = vpop.permute.xlu0 %26 }
  0x82   :  { %v33_v19 = vmul.f32 %v32_v14, %v27_v17  ;;  %v49_v24 = vmul.f32 %v48_v18, %v43_v16 }
  0x85   :  { %v38_v23 = vpop.permute.xlu0 %37 }
  0x86   :  { %v40_v25 = vadd.f32 %v38_v23, %v33_v19  ;;  %v53_v26 = vpop.permute.xlu1 %52 }
  0x87   :  { %v59_v27 = vmul.f32 %v58_v20, %v53_v26 }
  0x88   :  { %v50_v29 = vadd.f32 %v49_v24, %v40_v25 }
  0x8a   :  { %v60_v31 = vadd.f32 %v59_v27, %v50_v29  ;;  %v63_v32 = vpop.permute.xlu0 %62 }
  0x8b   :  { %v69_v33 = vmul.f32 %v68_v28, %v63_v32  ;;  %v73_v34 = vpop.permute.xlu1 %72 }
  0x8c   :  { %v79_v35 = vmul.f32 %v78_v30, %v73_v34 }
  0x8d   :  { %v70_v36 = vadd.f32 %v69_v33, %v60_v31 }
  0x8f   :  { %v80_v37 = vadd.f32 %v79_v35, %v70_v36  ;;  %v96_v42 = vpop.permute.xlu0 %95 }
  0x90   :  { %v85_v38 = vpop.permute.xlu1 %84 }
  0x91   :  { %v81_v39 = vmax.f32 %v80_v37, 0.0 }
  0x93   :  { %v90_v40 = vrot.slane %v81_v39, %v31_v11  ;;  %v106_v41 = vrot.slane %v81_v39, %v47_v13  ;;  %v126_v47 = vrot.slane %v81_v39, %v67_v21  ;;  %v116_v48 = vrot.slane %v81_v39, %v57_v15 }
  0x94   :  { %v121_v49 = vpop.permute.xlu0 %120 }
  0x95   :  { %v91_v43 = vmul.f32 %v90_v40, %v85_v38  ;;  %v101_v44 = vpop.permute.xlu1 %100  ;;  %v127_v53 = vmul.f32 %v126_v47, %v121_v49 }
  0x96   :  { %v107_v46 = vmul.f32 %v106_v41, %v101_v44 }
  0x97   :  { %v98_v45 = vadd.f32 %v96_v42, %v91_v43 }
  0x99   :  { %v108_v51 = vadd.f32 %v107_v46, %v98_v45 }
  0x9a   :  { %v111_v50 = vpop.permute.xlu1 %110 }
  0x9b   :  { %v117_v52 = vmul.f32 %v116_v48, %v111_v50 }
  0x9d   :  { %v118_v54 = vadd.f32 %v117_v52, %v108_v51 }
  0x9f   :  { %v128_v55 = vadd.f32 %v127_v53, %v118_v54 }
  0xa1   :  { %129 = vst [vmem:[#allocation2] sm:$0x3] %v128_v55 }
  0xa2   :  { %171 = shalt.err (!%p168_p4)
}
  0xa3   :  { %s172_s28 = scalar_lea.hbm %s252_s5, 32 }
  0xa4   :  { %p173_p5 = scmp.ne.s32.totalorder %s252_s5, %s172_s28  ;;  %p176_p6 = scmp.lt.u32.totalorder %s172_s28, %s252_s5 }
  0xa6   :  { %p178_p7 = pnand %p176_p6, %p173_p5 }
  0xa8   :  { %181 = shalt.err (!%p178_p7)
}
  0xa9   :  { %139 = dma.vmem_to_hbm [thread:$0]  %s137_s3, 32, %s252_s5, [#allocation3]  }
  0xaa   :  { %182 = dma.done.wait [#allocation3], 32  }
  0xab   :  { %183 = vsyncadd [#allocation3], 4294967264 }
  0xac   :  { %143 = vsyncpa [#allocation3], 1 }

</bundles_post_ra>
